<compile_context>
chip_gen: v7x
topology: tpu7x:2x2x1
jax: 0.10.0
libtpu: 0.0.40
codegen_flags: <defaults>
</compile_context>

<pallas_src>
import jax
import jax.numpy as jnp
import numpy as np
from jax.experimental import pallas as pl
from jax.experimental.pallas import tpu as pltpu

# ---------------- sizes (small, synthetic; scaled down from input_c=1024) ----------------
BS = 2
P_NUM = 128
INPUT_C = 128                     # scaled-down stand-in for input_c=1024
C = 128                           # padded lane width used for every layer
H1, H2, H3, OUT_C = 128, 64, 64, 3
LAYERS = [(INPUT_C, H1), (H1, H2), (H2, H3), (H3, OUT_C)]
N_LAYERS = len(LAYERS)


def init_params(key):
    """Synthetic folded (Conv1d + eval-mode BN) weights, zero-padded to (C, C)/(1, C) tiles."""
    ws, bs_ = [], []
    for cin, cout in LAYERS:
        key, kw, kb = jax.random.split(key, 3)
        w = jax.random.normal(kw, (cin, cout), jnp.float32) / jnp.sqrt(float(cin))
        b = 0.01 * jax.random.normal(kb, (1, cout), jnp.float32)
        ws.append(jnp.zeros((C, C), jnp.float32).at[:cin, :cout].set(w))
        bs_.append(jnp.zeros((1, C), jnp.float32).at[:, :cout].set(b))
    wslab = jnp.concatenate(ws, axis=0).astype(jnp.bfloat16)   # (N_LAYERS*C, C) bf16
    bslab = jnp.concatenate(bs_, axis=0)                       # (N_LAYERS, C)   f32
    return wslab, bslab


# ------------------------------------ kernel ------------------------------------
def _tnet_kernel(x_ref, pts_ref, w_ref, b_ref, o_ref):
    # x_ref:   (BS, INPUT_C, P_NUM) f32   feat in native torch NCW layout
    # pts_ref: (BS, P_NUM, 3)       f32   points
    # w_ref:   (N_LAYERS*C, C)      bf16  folded conv+BN weights (zero-padded tiles)
    # b_ref:   (N_LAYERS, C)        f32   folded biases
    # o_ref:   (BS, OUT_C)          f32   Pred_T

    def matmul_bias(x_bf16, i):
        w = w_ref[i * C:(i + 1) * C, :]                       # static slice -> (C, C) bf16
        y = jnp.dot(x_bf16, w, preferred_element_type=jnp.float32)   # f32 accumulation
        return y + b_ref[i:i + 1, :]                          # f32 bias add

    # ---- layer 1: fused NCW->NWC transpose (XLU) + 1x1 conv; batch folded into M ----
    x_t = jnp.concatenate([x_ref[b].T for b in range(BS)], axis=0)   # (BS*P, INPUT_C) f32
    h = matmul_bias(x_t.astype(jnp.bfloat16), 0)
    h = jnp.maximum(h, 0.0).astype(jnp.bfloat16)              # ReLU in f32, bf16 carry

    # ---- layer 2 ----
    h = matmul_bias(h, 1)
    h = jnp.maximum(h, 0.0)                                   # (BS*P, C) f32

    # ---- global max-pool over points: leading-axis split + sublane reduce per batch ----
    pooled = h.reshape(BS, P_NUM, C).max(axis=1)              # (BS, C) f32
    # zero-padded channels stay exactly 0 (ReLU precedes pool; downstream weight rows are 0)

    # ---- layers 3-4 (dropout = identity in eval mode) ----
    g = matmul_bias(pooled.astype(jnp.bfloat16), 2)
    g = jnp.maximum(g, 0.0).astype(jnp.bfloat16)
    t_full = matmul_bias(g, 3)                                # (BS, C) f32, T in lanes 0:OUT_C

    # ---- fused epilogue: Pred_T = T + points.mean(dim=1) ----
    mean_pts = jnp.mean(pts_ref[...], axis=1)                 # (BS, 3) f32
    o_ref[...] = t_full[:, :OUT_C] + mean_pts


# ------------------------------------ wrapper ------------------------------------
def tnet_forward(feat, points, wslab, bslab):
    """feat: (bs, INPUT_C, p) f32 (torch NCW); points: (bs, p, 3) f32 -> Pred_T (bs, 3)."""
    bs, _, _ = feat.shape
    vmem = pl.BlockSpec(memory_space=pltpu.MemorySpace.VMEM)
    return pl.pallas_call(
        _tnet_kernel,
        out_shape=jax.ShapeDtypeStruct((bs, OUT_C), jnp.float32),
        in_specs=[vmem, vmem, vmem, vmem],
        out_specs=vmem,
    )(feat, points, wslab, bslab)


# -------------------------- pure-JAX reference (same precision) --------------------------
def tnet_reference(feat, points, wslab, bslab):
    bs, c, p = feat.shape
    x = jnp.transpose(feat, (0, 2, 1)).reshape(bs * p, c).astype(jnp.bfloat16)

    def layer(x_bf16, i, relu=True):
        w = wslab[i * C:(i + 1) * C, :]
        y = jnp.dot(x_bf16, w, preferred_element_type=jnp.float32) + bslab[i:i + 1, :]
        return jnp.maximum(y, 0.0) if relu else y

    h = layer(x, 0).astype(jnp.bfloat16)
    h = layer(h, 1)
    pooled = h.reshape(bs, p, C).max(axis=1).astype(jnp.bfloat16)
    g = layer(pooled, 2).astype(jnp.bfloat16)
    t_full = layer(g, 3, relu=False)
    return t_full[:, :OUT_C] + jnp.mean(points, axis=1)


if __name__ == "__main__":
    key = jax.random.PRNGKey(0)
    kp, kf, kx = jax.random.split(key, 3)
    wslab, bslab = init_params(kp)
    feat = jax.random.normal(kf, (BS, INPUT_C, P_NUM), jnp.float32)   # torch NCW layout
    points = jax.random.normal(kx, (BS, P_NUM, 3), jnp.float32)

    pred_t = jax.jit(tnet_forward)(feat, points, wslab, bslab)
    pred_t = jax.block_until_ready(pred_t)

    assert pred_t.shape == (BS, OUT_C), pred_t.shape
    assert bool(jnp.all(jnp.isfinite(pred_t)))

    ref = jax.jit(tnet_reference)(feat, points, wslab, bslab)
    np.testing.assert_allclose(np.asarray(pred_t), np.asarray(ref), rtol=5e-2, atol=5e-2)

    print("KERNEL_OK")
</pallas_src>

<mosaic_0001>
module attributes {stable_mosaic.version = 11 : i64} {
  func.func @_tnet_kernel(%arg0: memref<2x128x128xf32, #tpu.memory_space<vmem>>, %arg1: memref<2x128x3xf32, #tpu.memory_space<vmem>>, %arg2: memref<512x128xbf16, #tpu.memory_space<vmem>>, %arg3: memref<4x128xf32, #tpu.memory_space<vmem>>, %arg4: memref<2x3xf32, #tpu.memory_space<vmem>>) attributes {dimension_semantics = [], scalar_prefetch = 0 : i64, scratch_operands = 0 : i64, tpu.core_type = #tpu.core_type<tc>} {
    %c0 = arith.constant 0 : index
    %c0_0 = arith.constant 0 : index
    %c0_1 = arith.constant 0 : index
    %0 = vector.load %arg0[%c0, %c0_0, %c0_1] : memref<2x128x128xf32, #tpu.memory_space<vmem>>, vector<1x128x128xf32>
    %1 = vector.shape_cast %0 : vector<1x128x128xf32> to vector<128x128xf32>
    %2 = tpu.transpose %1, [1, 0] : vector<128x128xf32> -> vector<128x128xf32>
    %c1 = arith.constant 1 : index
    %c0_2 = arith.constant 0 : index
    %c0_3 = arith.constant 0 : index
    %3 = vector.load %arg0[%c1, %c0_2, %c0_3] : memref<2x128x128xf32, #tpu.memory_space<vmem>>, vector<1x128x128xf32>
    %4 = vector.shape_cast %3 : vector<1x128x128xf32> to vector<128x128xf32>
    %5 = tpu.transpose %4, [1, 0] : vector<128x128xf32> -> vector<128x128xf32>
    %6 = tpu.concatenate %2, %5 in 0 : vector<128x128xf32>, vector<128x128xf32> -> vector<256x128xf32>
    %7 = arith.truncf %6 : vector<256x128xf32> to vector<256x128xbf16>
    %c0_4 = arith.constant 0 : index
    %c0_5 = arith.constant 0 : index
    %8 = vector.load %arg2[%c0_4, %c0_5] : memref<512x128xbf16, #tpu.memory_space<vmem>>, vector<128x128xbf16>
    %cst = arith.constant dense<0.000000e+00> : vector<256x128xf32>
    %9 = tpu.matmul %7, %8, %cst {dimension_numbers = #tpu.dot_dimension_numbers<[1], [0], [0], [1], [0, 0, 1, 1], [], []>} : vector<256x128xbf16>, vector<128x128xbf16>, vector<256x128xf32> -> vector<256x128xf32>
    %c0_6 = arith.constant 0 : index
    %c0_7 = arith.constant 0 : index
    %10 = vector.load %arg3[%c0_6, %c0_7] : memref<4x128xf32, #tpu.memory_space<vmem>>, vector<1x128xf32>
    %11 = vector.broadcast %10 : vector<1x128xf32> to vector<256x128xf32>
    %12 = arith.addf %9, %11 : vector<256x128xf32>
    %cst_8 = arith.constant 0.000000e+00 : f32
    %13 = vector.broadcast %cst_8 : f32 to vector<256x128xf32>
    %14 = arith.maximumf %12, %13 : vector<256x128xf32>
    %15 = arith.truncf %14 : vector<256x128xf32> to vector<256x128xbf16>
    %c128 = arith.constant 128 : index
    %c0_9 = arith.constant 0 : index
    %16 = vector.load %arg2[%c128, %c0_9] : memref<512x128xbf16, #tpu.memory_space<vmem>>, vector<128x128xbf16>
    %cst_10 = arith.constant dense<0.000000e+00> : vector<256x128xf32>
    %17 = tpu.matmul %15, %16, %cst_10 {dimension_numbers = #tpu.dot_dimension_numbers<[1], [0], [0], [1], [0, 0, 1, 1], [], []>} : vector<256x128xbf16>, vector<128x128xbf16>, vector<256x128xf32> -> vector<256x128xf32>
    %c1_11 = arith.constant 1 : index
    %c0_12 = arith.constant 0 : index
    %18 = vector.load %arg3[%c1_11, %c0_12] : memref<4x128xf32, #tpu.memory_space<vmem>>, vector<1x128xf32>
    %19 = vector.broadcast %18 : vector<1x128xf32> to vector<256x128xf32>
    %20 = arith.addf %17, %19 : vector<256x128xf32>
    %cst_13 = arith.constant 0.000000e+00 : f32
    %21 = vector.broadcast %cst_13 : f32 to vector<256x128xf32>
    %22 = arith.maximumf %20, %21 : vector<256x128xf32>
    %23 = vector.shape_cast %22 : vector<256x128xf32> to vector<2x128x128xf32>
    %cst_14 = arith.constant dense<0xFF800000> : vector<2x128xf32>
    %24 = vector.multi_reduction <maximumf>, %23, %cst_14 [1] : vector<2x128x128xf32> to vector<2x128xf32>
    %25 = arith.truncf %24 : vector<2x128xf32> to vector<2x128xbf16>
    %c256 = arith.constant 256 : index
    %c0_15 = arith.constant 0 : index
    %26 = vector.load %arg2[%c256, %c0_15] : memref<512x128xbf16, #tpu.memory_space<vmem>>, vector<128x128xbf16>
    %cst_16 = arith.constant dense<0.000000e+00> : vector<2x128xf32>
    %27 = tpu.matmul %25, %26, %cst_16 {dimension_numbers = #tpu.dot_dimension_numbers<[1], [0], [0], [1], [0, 0, 1, 1], [], []>} : vector<2x128xbf16>, vector<128x128xbf16>, vector<2x128xf32> -> vector<2x128xf32>
    %c2 = arith.constant 2 : index
    %c0_17 = arith.constant 0 : index
    %28 = vector.load %arg3[%c2, %c0_17] : memref<4x128xf32, #tpu.memory_space<vmem>>, vector<1x128xf32>
    %29 = vector.broadcast %28 : vector<1x128xf32> to vector<2x128xf32>
    %30 = arith.addf %27, %29 : vector<2x128xf32>
    %cst_18 = arith.constant 0.000000e+00 : f32
    %31 = vector.broadcast %cst_18 : f32 to vector<2x128xf32>
    %32 = arith.maximumf %30, %31 : vector<2x128xf32>
    %33 = arith.truncf %32 : vector<2x128xf32> to vector<2x128xbf16>
    %c384 = arith.constant 384 : index
    %c0_19 = arith.constant 0 : index
    %34 = vector.load %arg2[%c384, %c0_19] : memref<512x128xbf16, #tpu.memory_space<vmem>>, vector<128x128xbf16>
    %cst_20 = arith.constant dense<0.000000e+00> : vector<2x128xf32>
    %35 = tpu.matmul %33, %34, %cst_20 {dimension_numbers = #tpu.dot_dimension_numbers<[1], [0], [0], [1], [0, 0, 1, 1], [], []>} : vector<2x128xbf16>, vector<128x128xbf16>, vector<2x128xf32> -> vector<2x128xf32>
    %c3 = arith.constant 3 : index
    %c0_21 = arith.constant 0 : index
    %36 = vector.load %arg3[%c3, %c0_21] : memref<4x128xf32, #tpu.memory_space<vmem>>, vector<1x128xf32>
    %37 = vector.broadcast %36 : vector<1x128xf32> to vector<2x128xf32>
    %38 = arith.addf %35, %37 : vector<2x128xf32>
    %c0_22 = arith.constant 0 : index
    %c0_23 = arith.constant 0 : index
    %c0_24 = arith.constant 0 : index
    %39 = vector.load %arg1[%c0_22, %c0_23, %c0_24] : memref<2x128x3xf32, #tpu.memory_space<vmem>>, vector<2x128x3xf32>
    %cst_25 = arith.constant dense<0.000000e+00> : vector<2x3xf32>
    %40 = vector.multi_reduction <add>, %39, %cst_25 [1] : vector<2x128x3xf32> to vector<2x3xf32>
    %cst_26 = arith.constant 1.280000e+02 : f32
    %41 = vector.broadcast %cst_26 : f32 to vector<2x3xf32>
    %42 = arith.divf %40, %41 : vector<2x3xf32>
    %43 = vector.extract_strided_slice %38 {offsets = [0, 0], sizes = [2, 3], strides = [1, 1]} : vector<2x128xf32> to vector<2x3xf32>
    %44 = arith.addf %43, %42 : vector<2x3xf32>
    %c0_27 = arith.constant 0 : index
    %c0_28 = arith.constant 0 : index
    %45 = vector.load %arg4[%c0_27, %c0_28] : memref<2x3xf32, #tpu.memory_space<vmem>>, vector<2x3xf32>
    tpu.vector_store %arg4[%c0_27, %c0_28], %44 {strides = array<i32>} : memref<2x3xf32, #tpu.memory_space<vmem>>, vector<2x3xf32>,
    return
  }
}

</mosaic_0001>

<bundles_post_ra>
// kernel: tnet_forward.1
= control target key start
LH: loop header
LB: loop body
LE: loop exit
PB: predicated region body
PF: predicated region fallthrough
CT: control target
= control target key end

     0   :  { %9 = vsyncpa [#allocation3], 0  ;;  %s1809_s0 = inlined_call_operand.vmem [shape: f32[2,128,128], index: 0, kind: input, shape index: {}]   ;;  %s1810_s1 = inlined_call_operand.vmem [shape: f32[2,128,3], index: 1, kind: input, shape index: {}]   ;;  %s1811_s2 = inlined_call_operand.hbm [shape: bf16[512,128], index: 2, kind: input, shape index: {}]   ;;  %s1812_s3 = inlined_call_operand.vmem [shape: f32[4,128], index: 3, kind: input, shape index: {}]   ;;  %s1813_s4 = inlined_call_operand.hbm [shape: f32[2,3], index: 4, kind: output, shape index: {}]  }
   0x1   :  { %10 = vsyncpa [#allocation4], 0  ;;  %s1430_s15 = smov [#allocation2]   ;;  %s1382_s19 = scalar_lea.hbm %s1811_s2, 4096 }
   0x2   :  { %s20_s16 = sshll.u32 %s1430_s15, 4  ;;  %p1383_p0 = scmp.ne.s32.totalorder %s1811_s2, %s1382_s19  ;;  %s21_s16 = int_to_ptr.vmem [resolvable:$true] %s20_s16 }
   0x3   :  { %p1386_p1 = scmp.lt.u32.totalorder %s1382_s19, %s1811_s2 }
   0x5   :  { %p1388_p2 = pnand %p1386_p1, %p1383_p0 }
   0x7   :  { %1391 = shalt.err (!%p1388_p2)
}
   0x8   :  { %s1392_s24 = scalar_lea.vmem %s21_s16, 4096  ;;  %p1397_p4 = scmp.lt.s32.totalorder %s21_s16, %s21_s16 }
   0x9   :  { %p1393_p3 = scmp.ne.s32.totalorder %s21_s16, %s1392_s24  ;;  %p1398_p5 = scmp.lt.s32.totalorder %s1392_s24, %s1392_s24 }
   0xb   :  { %p1399_p6 = por %p1398_p5, %p1397_p4 }
   0xd   :  { %p1400_p7 = pnand %p1399_p6, %p1393_p3 }
   0xf   :  { %1403 = shalt.err (!%p1400_p7)
}
  0x10   :  { %s1431_s25 = smov 64   ;;  %s1432_s26 = smov 4  }
  0x11   :  { %26 = dma.hbm_to_vmem [thread:$0]  %s1811_s2, 4096, %s21_s16, [#allocation3], %s1431_s25, %s1431_s25, %s1432_s26  }
  0x12   :  { %1426 = dma.done.wait [#allocation3], 4096  }
  0x13   :  { %1427 = vsyncadd [#allocation3], 4294963200  ;;  %v33_v0 = vld [vmem:[%s1809_s0] sm:$0xff]  ;;  %v34_v1 = vld [vmem:[%s1809_s0 + $0x8] sm:$0xff]  ;;  %vm1434_vm0 = vmmov 0   ;;  %vm755_vm1 = vcmask 1041409  }
  0x14   :  { %49 = vxpose.xlu0.b32.start [1/16] %v33_v0, 128  ;;  %v1090_v2 = vld [vmem:[%s1809_s0 + $0x80] sm:$0xff]  ;;  %v1091_v3 = vld [vmem:[%s1809_s0 + $0x88] sm:$0xff]  ;;  %v35_v4 = vld [vmem:[%s1809_s0 + $0x10] sm:$0xff]  ;;  %vm990_vm2 = vcmask 23552   ;;  %s1435_s26 = smov [#allocation5]   ;;  %vm1073_vm3 = vcmask 17408  }
  0x15   :  { %98 = vxpose.xlu1.b32.start [1/16] %v1090_v2, 128  ;;  %v1092_v5 = vld [vmem:[%s1809_s0 + $0x90] sm:$0xff]  ;;  %v36_v6 = vld [vmem:[%s1809_s0 + $0x18] sm:$0xff]  ;;  %v1350_v8 = vld [vmem:[#allocation2] sm:$0xff]   ;;  %s1081_s27 = sshll.u32 %s1435_s26, 4  ;;  %s1082_s27 = int_to_ptr.vmem [resolvable:$true] %s1081_s27 }
  0x16   :  { %v1093_v7 = vld [vmem:[%s1809_s0 + $0x98] sm:$0xff]  ;;  %v1351_v9 = vld [vmem:[#allocation2 + $0x8] sm:$0xff]   ;;  %1208 = vmatprep.subr.bf16.mxu0 %v1350_v8  ;;  %v37_v10 = vld [vmem:[%s1809_s0 + $0x20] sm:$0xff]  ;;  %s1404_s28 = scalar_lea.vmem %s1082_s27, 32  ;;  %p1409_p9 = scmp.lt.s32.totalorder %s1082_s27, %s1082_s27 }
  0x17   :  { %1209 = vmatpush3.bf16.msra.mxu0 %v1350_v8  ;;  %v1352_v11 = vld [vmem:[#allocation2 + $0x10] sm:$0xff]   ;;  %v1094_v12 = vld [vmem:[%s1809_s0 + $0xa0] sm:$0xff]  ;;  %v38_v13 = vld [vmem:[%s1809_s0 + $0x28] sm:$0xff]  ;;  %p1405_p8 = scmp.ne.s32.totalorder %s1082_s27, %s1404_s28  ;;  %p1410_p10 = scmp.lt.s32.totalorder %s1404_s28, %s1404_s28 }
  0x18   :  { %50 = vxpose.xlu0.b32.cont [2/16] %v34_v1, 128  ;;  %1210 = vmatprep.subr.bf16.mxu0 %v1351_v9  ;;  %v1095_v14 = vld [vmem:[%s1809_s0 + $0xa8] sm:$0xff]  ;;  %v1353_v15 = vld [vmem:[#allocation2 + $0x18] sm:$0xff]   ;;  %v39_v16 = vld [vmem:[%s1809_s0 + $0x30] sm:$0xff] }
  0x19   :  { %99 = vxpose.xlu1.b32.cont [2/16] %v1091_v3, 128  ;;  %v1354_v17 = vld [vmem:[#allocation2 + $0x20] sm:$0xff]   ;;  %v1096_v18 = vld [vmem:[%s1809_s0 + $0xb0] sm:$0xff]  ;;  %v40_v19 = vld [vmem:[%s1809_s0 + $0x38] sm:$0xff]  ;;  %p1411_p11 = por %p1410_p10, %p1409_p9 }
  0x1a   :  { %v1355_v20 = vld [vmem:[#allocation2 + $0x28] sm:$0xff]   ;;  %v1097_v21 = vld [vmem:[%s1809_s0 + $0xb8] sm:$0xff]  ;;  %v41_v22 = vld [vmem:[%s1809_s0 + $0x40] sm:$0xff] }
  0x1b   :  { %1211 = vmatpush3.bf16.msra.mxu0 %v1351_v9  ;;  %v1356_v23 = vld [vmem:[#allocation2 + $0x30] sm:$0xff]   ;;  %v1098_v24 = vld [vmem:[%s1809_s0 + $0xc0] sm:$0xff]  ;;  %v42_v25 = vld [vmem:[%s1809_s0 + $0x48] sm:$0xff]  ;;  %p1412_p12 = pnand %p1411_p11, %p1405_p8 }
  0x1c   :  { %51 = vxpose.xlu0.b32.cont [3/16] %v35_v4, 128  ;;  %1212 = vmatprep.subr.bf16.mxu0 %v1352_v11  ;;  %v1357_v26 = vld [vmem:[#allocation2 + $0x38] sm:$0xff]   ;;  %v1099_v27 = vld [vmem:[%s1809_s0 + $0xc8] sm:$0xff]  ;;  %v43_v28 = vld [vmem:[%s1809_s0 + $0x50] sm:$0xff] }
  0x1d   :  { %100 = vxpose.xlu1.b32.cont [3/16] %v1092_v5, 128  ;;  %v1100_v29 = vld [vmem:[%s1809_s0 + $0xd0] sm:$0xff]  ;;  %v44_v30 = vld [vmem:[%s1809_s0 + $0x58] sm:$0xff]  ;;  %v45_v32 = vld [vmem:[%s1809_s0 + $0x60] sm:$0xff] }
  0x1e   :  { %v1101_v31 = vld [vmem:[%s1809_s0 + $0xd8] sm:$0xff]  ;;  %v1102_v33 = vld [vmem:[%s1809_s0 + $0xe0] sm:$0xff]  ;;  %v46_v34 = vld [vmem:[%s1809_s0 + $0x68] sm:$0xff] }
  0x1f   :  { %1213 = vmatpush3.bf16.msra.mxu0 %v1352_v11  ;;  %v1103_v35 = vld [vmem:[%s1809_s0 + $0xe8] sm:$0xff]  ;;  %v47_v36 = vld [vmem:[%s1809_s0 + $0x70] sm:$0xff]  ;;  %v48_v38 = vld [vmem:[%s1809_s0 + $0x78] sm:$0xff] }
  0x20   :  { %52 = vxpose.xlu0.b32.cont [4/16] %v36_v6, 128  ;;  %1214 = vmatprep.subr.bf16.mxu0 %v1353_v15  ;;  %v1104_v37 = vld [vmem:[%s1809_s0 + $0xf0] sm:$0xff]  ;;  %v1105_v39 = vld [vmem:[%s1809_s0 + $0xf8] sm:$0xff]  ;;  %v1358_v40 = vld [vmem:[#allocation2 + $0x40] sm:$0xff]  }
  0x21   :  { %101 = vxpose.xlu1.b32.cont [4/16] %v1093_v7, 128  ;;  %v1359_v41 = vld [vmem:[#allocation2 + $0x48] sm:$0xff]   ;;  %1256 = vmatprep.subr.bf16.mxu1 %v1358_v40  ;;  %v1360_v42 = vld [vmem:[#allocation2 + $0x50] sm:$0xff]   ;;  %v1361_v43 = vld [vmem:[#allocation2 + $0x58] sm:$0xff]  }
  0x22   :  { %1257 = vmatpush3.bf16.msra.mxu1 %v1358_v40  ;;  %v1362_v44 = vld [vmem:[#allocation2 + $0x60] sm:$0xff]   ;;  %v1363_v45 = vld [vmem:[#allocation2 + $0x68] sm:$0xff]  }
  0x23   :  { %1215 = vmatpush3.bf16.msra.mxu0 %v1353_v15  ;;  %1258 = vmatprep.subr.bf16.mxu1 %v1359_v41 }
  0x24   :  { %53 = vxpose.xlu0.b32.cont [5/16] %v37_v10, 128  ;;  %1216 = vmatprep.subr.bf16.mxu0 %v1354_v17 }
  0x25   :  { %102 = vxpose.xlu1.b32.cont [5/16] %v1094_v12, 128 }
  0x26   :  { %1259 = vmatpush3.bf16.msra.mxu1 %v1359_v41 }
  0x27   :  { %1217 = vmatpush3.bf16.msra.mxu0 %v1354_v17  ;;  %1260 = vmatprep.subr.bf16.mxu1 %v1360_v42 }
  0x28   :  { %54 = vxpose.xlu0.b32.cont [6/16] %v38_v13, 128  ;;  %1218 = vmatprep.subr.bf16.mxu0 %v1355_v20 }
  0x29   :  { %103 = vxpose.xlu1.b32.cont [6/16] %v1095_v14, 128 }
  0x2a   :  { %1261 = vmatpush3.bf16.msra.mxu1 %v1360_v42 }
  0x2b   :  { %1219 = vmatpush3.bf16.msra.mxu0 %v1355_v20  ;;  %1262 = vmatprep.subr.bf16.mxu1 %v1361_v43 }
  0x2c   :  { %55 = vxpose.xlu0.b32.cont [7/16] %v39_v16, 128  ;;  %1220 = vmatprep.subr.bf16.mxu0 %v1356_v23 }
  0x2d   :  { %104 = vxpose.xlu1.b32.cont [7/16] %v1096_v18, 128 }
  0x2e   :  { %1263 = vmatpush3.bf16.msra.mxu1 %v1361_v43 }
  0x2f   :  { %1221 = vmatpush3.bf16.msra.mxu0 %v1356_v23  ;;  %1264 = vmatprep.subr.bf16.mxu1 %v1362_v44 }
  0x30   :  { %56 = vxpose.xlu0.b32.cont [8/16] %v40_v19, 128  ;;  %1222 = vmatprep.subr.bf16.mxu0 %v1357_v26 }
  0x31   :  { %105 = vxpose.xlu1.b32.cont [8/16] %v1097_v21, 128 }
  0x32   :  { %1265 = vmatpush3.bf16.msra.mxu1 %v1362_v44 }
  0x33   :  { %1223 = vmatpush3.bf16.msra.mxu0 %v1357_v26  ;;  %1266 = vmatprep.subr.bf16.mxu1 %v1363_v45 }
  0x34   :  { %57 = vxpose.xlu0.b32.cont [9/16] %v41_v22, 128 }
  0x35   :  { %106 = vxpose.xlu1.b32.cont [9/16] %v1098_v24, 128 }
  0x36   :  { %1267 = vmatpush3.bf16.msra.mxu1 %v1363_v45 }
  0x38   :  { %58 = vxpose.xlu0.b32.cont [10/16] %v42_v25, 128 }
  0x39   :  { %107 = vxpose.xlu1.b32.cont [10/16] %v1099_v27, 128 }
  0x3c   :  { %59 = vxpose.xlu0.b32.cont [11/16] %v43_v28, 128 }
  0x3d   :  { %108 = vxpose.xlu1.b32.cont [11/16] %v1100_v29, 128 }
  0x40   :  { %60 = vxpose.xlu0.b32.cont [12/16] %v44_v30, 128  ;;  %v1364_v30 = vld [vmem:[#allocation2 + $0x70] sm:$0xff]  }
  0x41   :  { %109 = vxpose.xlu1.b32.cont [12/16] %v1101_v31, 128  ;;  %1268 = vmatprep.subr.bf16.mxu1 %v1364_v30  ;;  %v1365_v31 = vld [vmem:[#allocation2 + $0x78] sm:$0xff]  }
  0x42   :  { %1269 = vmatpush3.bf16.msra.mxu1 %v1364_v30 }
  0x43   :  { %1270 = vmatprep.subr.bf16.mxu1 %v1365_v31 }
  0x44   :  { %61 = vxpose.xlu0.b32.cont [13/16] %v45_v32, 128  ;;  %v1572_v32 = vld [vmem:[%s1812_s3] ss:$0 sm:$0xff] }
  0x45   :  { %110 = vxpose.xlu1.b32.cont [13/16] %v1102_v33, 128 }
  0x46   :  { %1271 = vmatpush3.bf16.msra.mxu1 %v1365_v31 }
  0x48   :  { %62 = vxpose.xlu0.b32.cont [14/16] %v46_v34, 128 }
  0x49   :  { %111 = vxpose.xlu1.b32.cont [14/16] %v1103_v35, 128 }
  0x4c   :  { %63 = vxpose.xlu0.b32.cont [15/16] %v47_v36, 128 }
  0x4d   :  { %112 = vxpose.xlu1.b32.cont [15/16] %v1104_v37, 128 }
  0x50   :  { %64 = vxpose.xlu0.b32.end [16/16] %v48_v38, 128 }
  0x51   :  { %113 = vxpose.xlu1.b32.end [16/16] %v1105_v39, 128 }
  0x94   :  { %v65_v46 = vpop.trf.xlu0 }
  0x95   :  { %v114_v47 = vpop.trf.xlu1 }
  0x98   :  { %v66_v48 = vpop.trf.xlu0 }
  0x99   :  { %v130_v49 = vpack.c.bf16 %v66_v48, %v65_v46  ;;  %v115_v50 = vpop.trf.xlu1 }
  0x9a   :  { %v138_v17 = vpack.c.bf16 %v115_v50, %v114_v47 }
  0x9b   :  { %1224 = vmatprep.mubr.bf16.mxu0 %v130_v49 }
  0x9c   :  { %v67_v51 = vpop.trf.xlu0 }
  0x9d   :  { %v116_v53 = vpop.trf.xlu1 }
  0xa0   :  { %v68_v52 = vpop.trf.xlu0 }
  0xa1   :  { %v131_v54 = vpack.c.bf16 %v68_v52, %v67_v51  ;;  %v117_v56 = vpop.trf.xlu1 }
  0xa2   :  { %v139_v19 = vpack.c.bf16 %v117_v56, %v116_v53 }
  0xa3   :  { %1225 = vmatmul.mubr.bf16.vlgmr.msra.gmra.mrb[0].mxu0 %v131_v54 }
  0xa4   :  { %v69_v55 = vpop.trf.xlu0 }
  0xa5   :  { %v118_v60 = vpop.trf.xlu1 }
  0xa8   :  { %v70_v57 = vpop.trf.xlu0 }
  0xa9   :  { %v132_v58 = vpack.c.bf16 %v70_v57, %v69_v55  ;;  %v119_v63 = vpop.trf.xlu1 }
  0xaa   :  { %v140_v20 = vpack.c.bf16 %v119_v63, %v118_v60 }
  0xab   :  { %1228 = vmatprep.mubr.bf16.mxu0 %v132_v58 }
  0xac   :  { %v71_v59 = vpop.trf.xlu0 }
  0xad   :  { %v120_v2 = vpop.trf.xlu1 }
  0xb0   :  { %v72_v61 = vpop.trf.xlu0 }
  0xb1   :  { %v133_v62 = vpack.c.bf16 %v72_v61, %v71_v59  ;;  %v121_v5 = vpop.trf.xlu1 }
  0xb2   :  { %v141_v22 = vpack.c.bf16 %v121_v5, %v120_v2 }
  0xb3   :  { %1229 = vmatmul.mubr.bf16.gmra.mrb[4].mxu0 %v133_v62 }
  0xb4   :  { %v73_v0 = vpop.trf.xlu0 }
  0xb5   :  { %v122_v9 = vpop.trf.xlu1 }
  0xb8   :  { %v74_v1 = vpop.trf.xlu0 }
  0xb9   :  { %v134_v3 = vpack.c.bf16 %v74_v1, %v73_v0  ;;  %v123_v12 = vpop.trf.xlu1 }
  0xba   :  { %v142_v23 = vpack.c.bf16 %v123_v12, %v122_v9 }
  0xbb   :  { %1232 = vmatprep.mubr.bf16.mxu0 %v134_v3 }
  0xbc   :  { %v75_v4 = vpop.trf.xlu0 }
  0xbd   :  { %v124_v15 = vpop.trf.xlu1 }
  0xc0   :  { %v76_v6 = vpop.trf.xlu0 }
  0xc1   :  { %v135_v7 = vpack.c.bf16 %v76_v6, %v75_v4  ;;  %v125_v18 = vpop.trf.xlu1 }
  0xc2   :  { %v143_v26 = vpack.c.bf16 %v125_v18, %v124_v15 }
  0xc3   :  { %1233 = vmatmul.mubr.bf16.gmra.mrb[8].mxu0 %v135_v7 }
  0xc4   :  { %v77_v8 = vpop.trf.xlu0 }
  0xc5   :  { %v126_v21 = vpop.trf.xlu1 }
  0xc8   :  { %v78_v10 = vpop.trf.xlu0 }
  0xc9   :  { %v136_v11 = vpack.c.bf16 %v78_v10, %v77_v8  ;;  %v127_v24 = vpop.trf.xlu1 }
  0xca   :  { %v144_v27 = vpack.c.bf16 %v127_v24, %v126_v21 }
  0xcb   :  { %1236 = vmatprep.mubr.bf16.mxu0 %v136_v11 }
  0xcc   :  { %v79_v13 = vpop.trf.xlu0 }
  0xcd   :  { %v128_v25 = vpop.trf.xlu1 }
  0xd0   :  { %v80_v14 = vpop.trf.xlu0 }
  0xd1   :  { %v137_v16 = vpack.c.bf16 %v80_v14, %v79_v13  ;;  %v129_v28 = vpop.trf.xlu1 }
  0xd2   :  { %v145_v29 = vpack.c.bf16 %v129_v28, %v128_v25 }
  0xd3   :  { %1237 = vmatmul.mubr.bf16.gmra.mrb[12].mxu0 %v137_v16 }
  0xd4   :  { %1240 = vmatprep.mubr.bf16.mxu0 %v138_v17 }
  0xdb   :  { %1241 = vmatmul.mubr.bf16.gmra.mrb[16].mxu0 %v139_v19 }
  0xdc   :  { %1244 = vmatprep.mubr.bf16.mxu0 %v140_v20 }
  0xe3   :  { %1245 = vmatmul.mubr.bf16.gmra.mrb[20].mxu0 %v141_v22 }
  0xe4   :  { %1248 = vmatprep.mubr.bf16.mxu0 %v142_v23 }
  0xeb   :  { %1249 = vmatmul.mubr.bf16.gmra.mrb[24].mxu0 %v143_v26 }
  0xec   :  { %1252 = vmatprep.mubr.bf16.mxu0 %v144_v27 }
  0xf3   :  { %1253 = vmatmul.mubr.bf16.gmra.mrb[28].mxu0 %v145_v29 }
 0x176   :  { %v1226_v33 = vpop.f32.mrb[0].mxu0 }
 0x177   :  { %v258_v34 = vadd.f32 %v1226_v33, %v1572_v32  ;;  %v249_v35 = vpop.f32.mrb[1].mxu0 }
 0x178   :  { %v250_v36 = vadd.f32 %v1572_v32, %v249_v35  ;;  %v1227_v37 = vpop.f32.mrb[2].mxu0 }
 0x179   :  { %v261_v38 = vadd.f32 %v1227_v37, %v1572_v32  ;;  %v252_v39 = vpop.f32.mrb[3].mxu0  ;;  %v378_v41 = vmax.f32 %v258_v34, 0.0 }
 0x17a   :  { %v253_v40 = vadd.f32 %v1572_v32, %v252_v39  ;;  %v376_v43 = vmax.f32 %v250_v36, 0.0 }
 0x17b   :  { %v379_v42 = vmax.f32 %v261_v38, 0.0 }
 0x17c   :  { %v377_v44 = vmax.f32 %v253_v40, 0.0 }
 0x17d   :  { %v409_v45 = vpack.c.bf16 %v379_v42, %v378_v41 }
 0x17e   :  { %v408_v46 = vpack.c.bf16 %v377_v44, %v376_v43 }
 0x180   :  { %1272 = vmatprep.mubr.bf16.mxu1 %v408_v46 }
 0x181   :  { %1273 = vmatmul.mubr.bf16.vlgmr.msra.gmra.mrb[0].mxu1 %v409_v45 }
 0x186   :  { %v1230_v47 = vpop.f32.mrb[4].mxu0 }
 0x187   :  { %v274_v48 = vadd.f32 %v1230_v47, %v1572_v32  ;;  %v265_v49 = vpop.f32.mrb[5].mxu0 }
 0x188   :  { %v266_v50 = vadd.f32 %v1572_v32, %v265_v49  ;;  %v1231_v51 = vpop.f32.mrb[6].mxu0 }
 0x189   :  { %v277_v52 = vadd.f32 %v1231_v51, %v1572_v32  ;;  %v268_v53 = vpop.f32.mrb[7].mxu0  ;;  %v382_v55 = vmax.f32 %v274_v48, 0.0 }
 0x18a   :  { %v269_v54 = vadd.f32 %v1572_v32, %v268_v53  ;;  %v380_v57 = vmax.f32 %v266_v50, 0.0 }
 0x18b   :  { %v383_v56 = vmax.f32 %v277_v52, 0.0 }
 0x18c   :  { %v381_v58 = vmax.f32 %v269_v54, 0.0 }
 0x18d   :  { %v411_v59 = vpack.c.bf16 %v383_v56, %v382_v55 }
 0x18e   :  { %v410_v60 = vpack.c.bf16 %v381_v58, %v380_v57 }
 0x190   :  { %1276 = vmatprep.mubr.bf16.mxu1 %v410_v60 }
 0x191   :  { %1277 = vmatmul.mubr.bf16.gmra.mrb[4].mxu1 %v411_v59 }
 0x196   :  { %v1234_v61 = vpop.f32.mrb[8].mxu0 }
 0x197   :  { %v290_v62 = vadd.f32 %v1234_v61, %v1572_v32  ;;  %v281_v63 = vpop.f32.mrb[9].mxu0 }
 0x198   :  { %v282_v0 = vadd.f32 %v1572_v32, %v281_v63  ;;  %v1235_v1 = vpop.f32.mrb[10].mxu0 }
 0x199   :  { %v293_v2 = vadd.f32 %v1235_v1, %v1572_v32  ;;  %v284_v3 = vpop.f32.mrb[11].mxu0  ;;  %v386_v5 = vmax.f32 %v290_v62, 0.0 }
 0x19a   :  { %v285_v4 = vadd.f32 %v1572_v32, %v284_v3  ;;  %v384_v7 = vmax.f32 %v282_v0, 0.0 }
 0x19b   :  { %v387_v6 = vmax.f32 %v293_v2, 0.0 }
 0x19c   :  { %v385_v8 = vmax.f32 %v285_v4, 0.0 }
 0x19d   :  { %v413_v9 = vpack.c.bf16 %v387_v6, %v386_v5 }
 0x19e   :  { %v412_v10 = vpack.c.bf16 %v385_v8, %v384_v7 }
 0x1a0   :  { %1280 = vmatprep.mubr.bf16.mxu1 %v412_v10 }
 0x1a1   :  { %1281 = vmatmul.mubr.bf16.gmra.mrb[8].mxu1 %v413_v9 }
 0x1a6   :  { %v1238_v11 = vpop.f32.mrb[12].mxu0 }
 0x1a7   :  { %v306_v12 = vadd.f32 %v1238_v11, %v1572_v32  ;;  %v297_v13 = vpop.f32.mrb[13].mxu0 }
 0x1a8   :  { %v298_v14 = vadd.f32 %v1572_v32, %v297_v13  ;;  %v1239_v15 = vpop.f32.mrb[14].mxu0 }
 0x1a9   :  { %v309_v16 = vadd.f32 %v1239_v15, %v1572_v32  ;;  %v300_v17 = vpop.f32.mrb[15].mxu0  ;;  %v390_v19 = vmax.f32 %v306_v12, 0.0 }
 0x1aa   :  { %v301_v18 = vadd.f32 %v1572_v32, %v300_v17  ;;  %v388_v21 = vmax.f32 %v298_v14, 0.0 }
 0x1ab   :  { %v391_v20 = vmax.f32 %v309_v16, 0.0 }
 0x1ac   :  { %v389_v22 = vmax.f32 %v301_v18, 0.0  ;;  %v1433_v18 = vmov 0.0  }
 0x1ad   :  { %v415_v23 = vpack.c.bf16 %v391_v20, %v390_v19  ;;  %1304 = vmatprep.subr.bf16.mxu0 %v1433_v18  ;;  %1324 = vmatprep.subr.bf16.mxu1 %v1433_v18  ;;  %v1366_v19 = vld [vmem:[#allocation2 + $0x80] sm:$0xff]   ;;  %v1367_v20 = vld [vmem:[#allocation2 + $0x88] sm:$0xff]  }
 0x1ae   :  { %v414_v24 = vpack.c.bf16 %v389_v22, %v388_v21  ;;  %v1242_v25 = vpop.f32.mrb[16].mxu0  ;;  %1305 = vmatpush3.bf16.msra.mxu0 %v1366_v19  ;;  %v1369_v21 = vld [vmem:[#allocation2 + $0x98] sm:$0xff]   ;;  %v1370_v22 = vld [vmem:[#allocation2 + $0xa0] sm:$0xff]   ;;  %1320 = vmatprep.mubr.msk.bf16.mxu0 %vm1434_vm0, %v1433_v18 }
 0x1af   :  { %v322_v26 = vadd.f32 %v1242_v25, %v1572_v32  ;;  %v313_v27 = vpop.f32.mrb[17].mxu0  ;;  %1306 = vmatprep.subr.bf16.mxu0 %v1433_v18  ;;  %v1373_v25 = vld [vmem:[#allocation2 + $0xb8] sm:$0xff]  }
 0x1b0   :  { %v314_v28 = vadd.f32 %v1572_v32, %v313_v27  ;;  %v1243_v29 = vpop.f32.mrb[18].mxu0  ;;  %1284 = vmatprep.mubr.bf16.mxu1 %v414_v24  ;;  %v1372_v24 = vld [vmem:[#allocation2 + $0xb0] sm:$0xff]   ;;  %v1375_v27 = vld [vmem:[#allocation2 + $0xc8] sm:$0xff]  }
 0x1b1   :  { %v325_v30 = vadd.f32 %v1243_v29, %v1572_v32  ;;  %v316_v31 = vpop.f32.mrb[19].mxu0  ;;  %1285 = vmatmul.mubr.bf16.gmra.mrb[12].mxu1 %v415_v23  ;;  %v394_v34 = vmax.f32 %v322_v26, 0.0  ;;  %v1371_v23 = vld [vmem:[#allocation2 + $0xa8] sm:$0xff]   ;;  %v1374_v26 = vld [vmem:[#allocation2 + $0xc0] sm:$0xff]   ;;  %v1377_v29 = vld [vmem:[#allocation2 + $0xd8] sm:$0xff]  }
 0x1b2   :  { %v317_v33 = vadd.f32 %v1572_v32, %v316_v31  ;;  %v392_v36 = vmax.f32 %v314_v28, 0.0  ;;  %1307 = vmatpush3.bf16.msra.mxu0 %v1367_v20  ;;  %1325 = vmatpush3.bf16.msra.mxu1 %v1374_v26  ;;  %v1376_v28 = vld [vmem:[#allocation2 + $0xd0] sm:$0xff]   ;;  %v1378_v31 = vld [vmem:[#allocation2 + $0xe0] sm:$0xff]  }
 0x1b3   :  { %v395_v35 = vmax.f32 %v325_v30, 0.0  ;;  %1308 = vmatprep.subr.bf16.mxu0 %v1433_v18  ;;  %1326 = vmatprep.subr.bf16.mxu1 %v1433_v18  ;;  %v1623_v30 = vld [vmem:[%s1812_s3 + $0x1] ss:$0 sm:$0xff] }
 0x1b4   :  { %v393_v37 = vmax.f32 %v317_v33, 0.0 }
 0x1b5   :  { %v417_v38 = vpack.c.bf16 %v395_v35, %v394_v34 }
 0x1b6   :  { %v416_v39 = vpack.c.bf16 %v393_v37, %v392_v36  ;;  %v1246_v40 = vpop.f32.mrb[20].mxu0  ;;  %1327 = vmatpush3.bf16.msra.mxu1 %v1375_v27 }
 0x1b7   :  { %v338_v41 = vadd.f32 %v1246_v40, %v1572_v32  ;;  %v329_v42 = vpop.f32.mrb[21].mxu0  ;;  %1328 = vmatprep.subr.bf16.mxu1 %v1433_v18 }
 0x1b8   :  { %v330_v43 = vadd.f32 %v1572_v32, %v329_v42  ;;  %v1247_v44 = vpop.f32.mrb[22].mxu0  ;;  %1288 = vmatprep.mubr.bf16.mxu1 %v416_v39 }
 0x1b9   :  { %v341_v45 = vadd.f32 %v1247_v44, %v1572_v32  ;;  %v332_v46 = vpop.f32.mrb[23].mxu0  ;;  %1289 = vmatmul.mubr.bf16.gmra.mrb[16].mxu1 %v417_v38  ;;  %v398_v48 = vmax.f32 %v338_v41, 0.0  ;;  %v1379_v41 = vld [vmem:[#allocation2 + $0xe8] sm:$0xff]  }
 0x1ba   :  { %v333_v47 = vadd.f32 %v1572_v32, %v332_v46  ;;  %v396_v50 = vmax.f32 %v330_v43, 0.0  ;;  %1329 = vmatpush3.bf16.msra.mxu1 %v1376_v28 }
 0x1bb   :  { %v399_v49 = vmax.f32 %v341_v45, 0.0  ;;  %1330 = vmatprep.subr.bf16.mxu1 %v1433_v18 }
 0x1bc   :  { %v397_v51 = vmax.f32 %v333_v47, 0.0  ;;  %v1380_v47 = vld [vmem:[#allocation2 + $0xf0] sm:$0xff]  }
 0x1bd   :  { %v419_v52 = vpack.c.bf16 %v399_v49, %v398_v48  ;;  %v1381_v49 = vld [vmem:[#allocation2 + $0xf8] sm:$0xff]  }
 0x1be   :  { %v418_v53 = vpack.c.bf16 %v397_v51, %v396_v50  ;;  %v1250_v54 = vpop.f32.mrb[24].mxu0  ;;  %1331 = vmatpush3.bf16.msra.mxu1 %v1377_v29 }
 0x1bf   :  { %v354_v55 = vadd.f32 %v1250_v54, %v1572_v32  ;;  %v345_v56 = vpop.f32.mrb[25].mxu0  ;;  %1332 = vmatprep.subr.bf16.mxu1 %v1433_v18 }
 0x1c0   :  { %v346_v57 = vadd.f32 %v1572_v32, %v345_v56  ;;  %v1251_v58 = vpop.f32.mrb[26].mxu0  ;;  %1292 = vmatprep.mubr.bf16.mxu1 %v418_v53 }
 0x1c1   :  { %v357_v59 = vadd.f32 %v1251_v58, %v1572_v32  ;;  %v348_v60 = vpop.f32.mrb[27].mxu0  ;;  %1293 = vmatmul.mubr.bf16.gmra.mrb[20].mxu1 %v419_v52  ;;  %v402_v62 = vmax.f32 %v354_v55, 0.0 }
 0x1c2   :  { %v349_v61 = vadd.f32 %v1572_v32, %v348_v60  ;;  %v400_v0 = vmax.f32 %v346_v57, 0.0  ;;  %1333 = vmatpush3.bf16.msra.mxu1 %v1378_v31 }
 0x1c3   :  { %v403_v63 = vmax.f32 %v357_v59, 0.0  ;;  %1334 = vmatprep.subr.bf16.mxu1 %v1433_v18 }
 0x1c4   :  { %v401_v1 = vmax.f32 %v349_v61, 0.0 }
 0x1c5   :  { %v421_v2 = vpack.c.bf16 %v403_v63, %v402_v62 }
 0x1c6   :  { %v420_v3 = vpack.c.bf16 %v401_v1, %v400_v0  ;;  %v1254_v4 = vpop.f32.mrb[28].mxu0  ;;  %1335 = vmatpush3.bf16.msra.mxu1 %v1379_v41 }
 0x1c7   :  { %v370_v5 = vadd.f32 %v1254_v4, %v1572_v32  ;;  %v361_v6 = vpop.f32.mrb[29].mxu0  ;;  %1336 = vmatprep.subr.bf16.mxu1 %v1433_v18 }
 0x1c8   :  { %v362_v7 = vadd.f32 %v1572_v32, %v361_v6  ;;  %v1255_v8 = vpop.f32.mrb[30].mxu0  ;;  %1296 = vmatprep.mubr.bf16.mxu1 %v420_v3 }
 0x1c9   :  { %v373_v9 = vadd.f32 %v1255_v8, %v1572_v32  ;;  %v364_v10 = vpop.f32.mrb[31].mxu0  ;;  %1297 = vmatmul.mubr.bf16.gmra.mrb[24].mxu1 %v421_v2  ;;  %v406_v12 = vmax.f32 %v370_v5, 0.0 }
 0x1ca   :  { %v365_v11 = vadd.f32 %v1572_v32, %v364_v10  ;;  %v404_v14 = vmax.f32 %v362_v7, 0.0  ;;  %v1368_v32 = vld [vmem:[#allocation2 + $0x90] sm:$0xff]   ;;  %1337 = vmatpush3.bf16.msra.mxu1 %v1380_v47 }
 0x1cb   :  { %v407_v13 = vmax.f32 %v373_v9, 0.0  ;;  %1309 = vmatpush3.bf16.msra.mxu0 %v1368_v32  ;;  %1338 = vmatprep.subr.bf16.mxu1 %v1433_v18 }
 0x1cc   :  { %v405_v15 = vmax.f32 %v365_v11, 0.0  ;;  %1310 = vmatprep.subr.bf16.mxu0 %v1433_v18 }
 0x1cd   :  { %v423_v16 = vpack.c.bf16 %v407_v13, %v406_v12 }
 0x1ce   :  { %v422_v17 = vpack.c.bf16 %v405_v15, %v404_v14  ;;  %1339 = vmatpush3.bf16.msra.mxu1 %v1381_v49 }
 0x1cf   :  { %1311 = vmatpush3.bf16.msra.mxu0 %v1369_v21 }
 0x1d0   :  { %1300 = vmatprep.mubr.bf16.mxu1 %v422_v17  ;;  %1312 = vmatprep.subr.bf16.mxu0 %v1433_v18 }
 0x1d1   :  { %1301 = vmatmul.mubr.bf16.gmra.mrb[28].mxu1 %v423_v16 }
 0x1d2   :  { %1340 = vmatprep.mubr.msk.bf16.mxu1 %vm1434_vm0, %v1433_v18 }
 0x1d3   :  { %1313 = vmatpush3.bf16.msra.mxu0 %v1370_v22 }
 0x1d4   :  { %1314 = vmatprep.subr.bf16.mxu0 %v1433_v18 }
 0x1d7   :  { %1315 = vmatpush3.bf16.msra.mxu0 %v1371_v23 }
 0x1d8   :  { %1316 = vmatprep.subr.bf16.mxu0 %v1433_v18 }
 0x1db   :  { %1317 = vmatpush3.bf16.msra.mxu0 %v1372_v24 }
 0x1dc   :  { %1318 = vmatprep.subr.bf16.mxu0 %v1433_v18 }
 0x1df   :  { %1319 = vmatpush3.bf16.msra.mxu0 %v1373_v25 }
 0x254   :  { %v1274_v33 = vpop.f32.mrb[0].mxu1 }
 0x255   :  { %v536_v34 = vadd.f32 %v1274_v33, %v1623_v30  ;;  %v527_v35 = vpop.f32.mrb[1].mxu1 }
 0x256   :  { %v528_v36 = vadd.f32 %v1623_v30, %v527_v35  ;;  %v1275_v37 = vpop.f32.mrb[2].mxu1 }
 0x257   :  { %v656_v38 = vmax.f32 %v536_v34, 0.0  ;;  %v539_v39 = vadd.f32 %v1275_v37, %v1623_v30  ;;  %v530_v40 = vpop.f32.mrb[3].mxu1 }
 0x258   :  { %v654_v42 = vmax.f32 %v528_v36, 0.0  ;;  %v531_v43 = vadd.f32 %v1623_v30, %v530_v40 }
 0x259   :  { %v657_v44 = vmax.f32 %v539_v39, 0.0 }
 0x25a   :  { %v686_v45 = vmax.f32 %v654_v42, %v656_v38  ;;  %v655_v46 = vmax.f32 %v531_v43, 0.0 }
 0x25c   :  { %v687_v48 = vmax.f32 %v655_v46, %v657_v44 }
 0x264   :  { %v1278_v50 = vpop.f32.mrb[4].mxu1 }
 0x265   :  { %v543_v51 = vpop.f32.mrb[5].mxu1  ;;  %v552_v52 = vadd.f32 %v1278_v50, %v1623_v30 }
 0x266   :  { %v544_v53 = vadd.f32 %v1623_v30, %v543_v51  ;;  %v1279_v54 = vpop.f32.mrb[6].mxu1 }
 0x267   :  { %v546_v55 = vpop.f32.mrb[7].mxu1  ;;  %v555_v57 = vadd.f32 %v1279_v54, %v1623_v30  ;;  %v660_v59 = vmax.f32 %v552_v52, 0.0 }
 0x268   :  { %v658_v56 = vmax.f32 %v544_v53, 0.0  ;;  %v547_v58 = vadd.f32 %v1623_v30, %v546_v55 }
 0x269   :  { %v661_v62 = vmax.f32 %v555_v57, 0.0 }
 0x26a   :  { %v688_v60 = vmax.f32 %v686_v45, %v658_v56  ;;  %v659_v61 = vmax.f32 %v547_v58, 0.0 }
 0x26c   :  { %v689_v63 = vmax.f32 %v687_v48, %v659_v61  ;;  %v690_v0 = vmax.f32 %v688_v60, %v660_v59 }
 0x26e   :  { %v691_v1 = vmax.f32 %v689_v63, %v661_v62 }
 0x274   :  { %v1282_v2 = vpop.f32.mrb[8].mxu1 }
 0x275   :  { %v559_v3 = vpop.f32.mrb[9].mxu1  ;;  %v568_v4 = vadd.f32 %v1282_v2, %v1623_v30 }
 0x276   :  { %v560_v5 = vadd.f32 %v1623_v30, %v559_v3  ;;  %v1283_v6 = vpop.f32.mrb[10].mxu1 }
 0x277   :  { %v562_v7 = vpop.f32.mrb[11].mxu1  ;;  %v571_v9 = vadd.f32 %v1283_v6, %v1623_v30  ;;  %v664_v11 = vmax.f32 %v568_v4, 0.0 }
 0x278   :  { %v662_v8 = vmax.f32 %v560_v5, 0.0  ;;  %v563_v10 = vadd.f32 %v1623_v30, %v562_v7 }
 0x279   :  { %v665_v14 = vmax.f32 %v571_v9, 0.0 }
 0x27a   :  { %v692_v12 = vmax.f32 %v690_v0, %v662_v8  ;;  %v663_v13 = vmax.f32 %v563_v10, 0.0 }
 0x27c   :  { %v693_v15 = vmax.f32 %v691_v1, %v663_v13  ;;  %v694_v16 = vmax.f32 %v692_v12, %v664_v11 }
 0x27e   :  { %v695_v17 = vmax.f32 %v693_v15, %v665_v14 }
 0x284   :  { %v1286_v18 = vpop.f32.mrb[12].mxu1 }
 0x285   :  { %v575_v19 = vpop.f32.mrb[13].mxu1  ;;  %v584_v20 = vadd.f32 %v1286_v18, %v1623_v30 }
 0x286   :  { %v576_v32 = vadd.f32 %v1623_v30, %v575_v19  ;;  %v1287_v21 = vpop.f32.mrb[14].mxu1 }
 0x287   :  { %v578_v22 = vpop.f32.mrb[15].mxu1  ;;  %v587_v24 = vadd.f32 %v1287_v21, %v1623_v30  ;;  %v668_v26 = vmax.f32 %v584_v20, 0.0 }
 0x288   :  { %v666_v23 = vmax.f32 %v576_v32, 0.0  ;;  %v579_v25 = vadd.f32 %v1623_v30, %v578_v22 }
 0x289   :  { %v669_v31 = vmax.f32 %v587_v24, 0.0 }
 0x28a   :  { %v696_v27 = vmax.f32 %v694_v16, %v666_v23  ;;  %v667_v28 = vmax.f32 %v579_v25, 0.0 }
 0x28c   :  { %v698_v29 = vmax.f32 %v696_v27, %v668_v26  ;;  %v697_v33 = vmax.f32 %v695_v17, %v667_v28  ;;  %v1290_v34 = vpop.f32.mrb[16].mxu1 }
 0x28d   :  { %v600_v35 = vadd.f32 %v1290_v34, %v1623_v30  ;;  %v591_v36 = vpop.f32.mrb[17].mxu1 }
 0x28e   :  { %v699_v37 = vmax.f32 %v697_v33, %v669_v31  ;;  %v592_v38 = vadd.f32 %v1623_v30, %v591_v36  ;;  %v1291_v39 = vpop.f32.mrb[18].mxu1 }
 0x28f   :  { %v672_v40 = vmax.f32 %v600_v35, 0.0  ;;  %v603_v41 = vadd.f32 %v1291_v39, %v1623_v30  ;;  %v594_v42 = vpop.f32.mrb[19].mxu1 }
 0x290   :  { %v700_v43 = vmax.f32 %v698_v29, %v699_v37  ;;  %v670_v44 = vmax.f32 %v592_v38, 0.0  ;;  %v595_v45 = vadd.f32 %v1623_v30, %v594_v42 }
 0x291   :  { %v673_v46 = vmax.f32 %v603_v41, 0.0 }
 0x292   :  { %v707_v47 = vmax.f32 %v670_v44, %v672_v40  ;;  %v671_v48 = vmax.f32 %v595_v45, 0.0  ;;  %v701_v14 = vrot.slane %v700_v43, 4 }
 0x294   :  { %v708_v49 = vmax.f32 %v671_v48, %v673_v46  ;;  %v1294_v50 = vpop.f32.mrb[20].mxu1  ;;  %v702_v24 = vmax.f32 %v700_v43, %v701_v14 }
 0x295   :  { %v607_v51 = vpop.f32.mrb[21].mxu1  ;;  %v616_v52 = vadd.f32 %v1294_v50, %v1623_v30 }
 0x296   :  { %v608_v53 = vadd.f32 %v1623_v30, %v607_v51  ;;  %v1295_v54 = vpop.f32.mrb[22].mxu1  ;;  %v703_v33 = vrot.slane %v702_v24, 2 }
 0x297   :  { %v610_v55 = vpop.f32.mrb[23].mxu1  ;;  %v619_v57 = vadd.f32 %v1295_v54, %v1623_v30  ;;  %v676_v59 = vmax.f32 %v616_v52, 0.0 }
 0x298   :  { %v674_v56 = vmax.f32 %v608_v53, 0.0  ;;  %v611_v58 = vadd.f32 %v1623_v30, %v610_v55  ;;  %v704_v38 = vmax.f32 %v702_v24, %v703_v33  ;;  %v1124_v53 = vld [vmem:[%s1812_s3 + $0x2] ss:$0 sm:$0xff] }
 0x299   :  { %v677_v62 = vmax.f32 %v619_v57, 0.0 }
 0x29a   :  { %v709_v60 = vmax.f32 %v707_v47, %v674_v56  ;;  %v675_v61 = vmax.f32 %v611_v58, 0.0  ;;  %v705_v41 = vrot.slane %v704_v38, 1 }
 0x29c   :  { %v710_v63 = vmax.f32 %v708_v49, %v675_v61  ;;  %v1298_v0 = vpop.f32.mrb[24].mxu1  ;;  %v711_v1 = vmax.f32 %v709_v60, %v676_v59  ;;  %v706_v43 = vmax.f32 %v704_v38, %v705_v41  ;;  %v958_v61 = vld [vmem:[%s1810_s1] sm:$0xff] }
 0x29d   :  { %v623_v2 = vpop.f32.mrb[25].mxu1  ;;  %v632_v3 = vadd.f32 %v1298_v0, %v1623_v30  ;;  %v975_v0 = vld [vmem:[%s1810_s1 + $0x88] sm:$0xff] }
 0x29e   :  { %v624_v4 = vadd.f32 %v1623_v30, %v623_v2  ;;  %v1299_v5 = vpop.f32.mrb[26].mxu1  ;;  %v712_v6 = vmax.f32 %v710_v63, %v677_v62  ;;  %v728_v47 = vpack.c.bf16 %v706_v43, %v706_v43  ;;  %v959_v62 = vld [vmem:[%s1810_s1 + $0x8] sm:$0xff]  ;;  %v974_v63 = vld [vmem:[%s1810_s1 + $0x80] sm:$0xff] }
 0x29f   :  { %v626_v7 = vpop.f32.mrb[27].mxu1  ;;  %v635_v9 = vadd.f32 %v1299_v5, %v1623_v30  ;;  %v680_v11 = vmax.f32 %v632_v3, 0.0  ;;  %v992_v2 = vsel %vm990_vm2, %v959_v62, 0.0  ;;  %v1028_v3 = vsel %vm990_vm2, %v974_v63, 0.0  ;;  %v960_v5 = vld [vmem:[%s1810_s1 + $0x10] sm:$0xff] }
 0x2a0   :  { %v678_v8 = vmax.f32 %v624_v4, 0.0  ;;  %v627_v10 = vadd.f32 %v1623_v30, %v626_v7  ;;  %v753_v49 = vunpack.c.l.b16 %v728_v47  ;;  %v1029_v4 = vsel %vm990_vm2, %v975_v0, 0.0 }
 0x2a1   :  { %v681_v15 = vmax.f32 %v635_v9, 0.0  ;;  %v994_v9 = vsel %vm990_vm2, %v960_v5, 0.0 }
 0x2a2   :  { %v713_v12 = vmax.f32 %v711_v1, %v678_v8  ;;  %v679_v13 = vmax.f32 %v627_v10, 0.0  ;;  %v991_v1 = vsel %vm990_vm2, %v958_v61, 0.0  ;;  %v1030_v8 = vadd.f32 %v1029_v4, %v1028_v3 }
 0x2a3   :  { %v993_v7 = vadd.f32 %v992_v2, %v991_v1  ;;  %v970_v1 = vld [vmem:[%s1810_s1 + $0x60] sm:$0xff] }
 0x2a4   :  { %v714_v16 = vmax.f32 %v712_v6, %v679_v13  ;;  %v1302_v17 = vpop.f32.mrb[28].mxu1  ;;  %v715_v18 = vmax.f32 %v713_v12, %v680_v11  ;;  %v976_v6 = vld [vmem:[%s1810_s1 + $0x90] sm:$0xff]  ;;  %v961_v11 = vld [vmem:[%s1810_s1 + $0x18] sm:$0xff]  ;;  %v986_v2 = vld [vmem:[%s1810_s1 + $0xe0] sm:$0xff]  ;;  %v1014_v5 = vsel %vm990_vm2, %v970_v1, 0.0 }
 0x2a5   :  { %v639_v19 = vpop.f32.mrb[29].mxu1  ;;  %v648_v20 = vadd.f32 %v1302_v17, %v1623_v30  ;;  %v1031_v10 = vsel %vm990_vm2, %v976_v6, 0.0  ;;  %v977_v12 = vld [vmem:[%s1810_s1 + $0x98] sm:$0xff]  ;;  %v995_v13 = vadd.f32 %v994_v9, %v993_v7  ;;  %v962_v17 = vld [vmem:[%s1810_s1 + $0x20] sm:$0xff]  ;;  %v1051_v6 = vsel %vm990_vm2, %v986_v2, 0.0  ;;  %v971_v7 = vld [vmem:[%s1810_s1 + $0x68] sm:$0xff] }
 0x2a6   :  { %v640_v32 = vadd.f32 %v1623_v30, %v639_v19  ;;  %v1303_v21 = vpop.f32.mrb[30].mxu1  ;;  %v716_v22 = vmax.f32 %v714_v16, %v681_v15  ;;  %v1032_v14 = vadd.f32 %v1031_v10, %v1030_v8  ;;  %v996_v15 = vsel %vm990_vm2, %v961_v11, 0.0  ;;  %v987_v8 = vld [vmem:[%s1810_s1 + $0xe8] sm:$0xff] }
 0x2a7   :  { %v642_v23 = vpop.f32.mrb[31].mxu1  ;;  %v651_v26 = vadd.f32 %v1303_v21, %v1623_v30  ;;  %v684_v28 = vmax.f32 %v648_v20, 0.0  ;;  %v1033_v16 = vsel %vm990_vm2, %v977_v12, 0.0  ;;  %v997_v19 = vadd.f32 %v996_v15, %v995_v13  ;;  %v972_v13 = vld [vmem:[%s1810_s1 + $0x70] sm:$0xff] }
 0x2a8   :  { %v682_v25 = vmax.f32 %v640_v32, 0.0  ;;  %v643_v27 = vadd.f32 %v1623_v30, %v642_v23  ;;  %v1034_v20 = vadd.f32 %v1033_v16, %v1032_v14  ;;  %v998_v32 = vsel %vm990_vm2, %v962_v17, 0.0  ;;  %v979_v23 = vld [vmem:[%s1810_s1 + $0xa8] sm:$0xff]  ;;  %v988_v14 = vld [vmem:[%s1810_s1 + $0xf0] sm:$0xff] }
 0x2a9   :  { %v685_v35 = vmax.f32 %v651_v26, 0.0  ;;  %v999_v24 = vadd.f32 %v998_v32, %v997_v19  ;;  %v1016_v11 = vsel %vm990_vm2, %v971_v7, 0.0  ;;  %v1053_v12 = vsel %vm990_vm2, %v987_v8, 0.0  ;;  %v973_v19 = vld [vmem:[%s1810_s1 + $0x78] sm:$0xff] }
 0x2aa   :  { %v717_v29 = vmax.f32 %v715_v18, %v682_v25  ;;  %v683_v31 = vmax.f32 %v643_v27, 0.0  ;;  %v978_v18 = vld [vmem:[%s1810_s1 + $0xa0] sm:$0xff]  ;;  %v1037_v27 = vsel %vm990_vm2, %v979_v23, 0.0  ;;  %v1018_v17 = vsel %vm990_vm2, %v972_v13, 0.0 }
 0x2ab   :  { %v1035_v21 = vsel %vm990_vm2, %v978_v18, 0.0  ;;  %v1055_v18 = vsel %vm990_vm2, %v988_v14, 0.0 }
 0x2ac   :  { %v719_v34 = vmax.f32 %v717_v29, %v684_v28  ;;  %v718_v36 = vmax.f32 %v716_v22, %v683_v31  ;;  %v963_v22 = vld [vmem:[%s1810_s1 + $0x28] sm:$0xff]  ;;  %v1036_v25 = vadd.f32 %v1035_v21, %v1034_v20  ;;  %v964_v28 = vld [vmem:[%s1810_s1 + $0x30] sm:$0xff]  ;;  %v989_v20 = vld [vmem:[%s1810_s1 + $0xf8] sm:$0xff] }
 0x2ad   :  { %v1000_v26 = vsel %vm990_vm2, %v963_v22, 0.0  ;;  %v980_v29 = vld [vmem:[%s1810_s1 + $0xb0] sm:$0xff]  ;;  %v1020_v22 = vsel %vm990_vm2, %v973_v19, 0.0  ;;  %v1057_v23 = vsel %vm990_vm2, %v989_v20, 0.0 }
 0x2ae   :  { %v720_v37 = vmax.f32 %v718_v36, %v685_v35  ;;  %v1001_v31 = vadd.f32 %v1000_v26, %v999_v24  ;;  %v1038_v33 = vadd.f32 %v1037_v27, %v1036_v25  ;;  %v1039_v35 = vsel %vm990_vm2, %v980_v29, 0.0  ;;  %v965_v36 = vld [vmem:[%s1810_s1 + $0x38] sm:$0xff] }
 0x2b0   :  { %v721_v39 = vmax.f32 %v719_v34, %v720_v37  ;;  %v1002_v34 = vsel %vm990_vm2, %v964_v28, 0.0  ;;  %v981_v37 = vld [vmem:[%s1810_s1 + $0xb8] sm:$0xff] }
 0x2b1   :  { %v1003_v38 = vadd.f32 %v1002_v34, %v1001_v31  ;;  %v1041_v41 = vsel %vm990_vm2, %v981_v37, 0.0 }
 0x2b2   :  { %v722_v40 = vrot.slane %v721_v39, 4 }
 0x2b4   :  { %v723_v42 = vmax.f32 %v721_v39, %v722_v40  ;;  %v1040_v39 = vadd.f32 %v1039_v35, %v1038_v33  ;;  %v1004_v40 = vsel %vm990_vm2, %v965_v36, 0.0 }
 0x2b5   :  { %v1005_v43 = vadd.f32 %v1004_v40, %v1003_v38 }
 0x2b6   :  { %v724_v44 = vrot.slane %v723_v42, 2 }
 0x2b8   :  { %v725_v45 = vmax.f32 %v723_v42, %v724_v44  ;;  %v966_v42 = vld [vmem:[%s1810_s1 + $0x40] sm:$0xff] }
 0x2b9   :  { %v982_v44 = vld [vmem:[%s1810_s1 + $0xc0] sm:$0xff] }
 0x2ba   :  { %v726_v46 = vrot.slane %v725_v45, 1  ;;  %v1043_v47 = vsel %vm990_vm2, %v982_v44, 0.0 }
 0x2bc   :  { %v727_v48 = vmax.f32 %v725_v45, %v726_v46  ;;  %v1042_v45 = vadd.f32 %v1041_v41, %v1040_v39  ;;  %v1006_v46 = vsel %vm990_vm2, %v966_v42, 0.0  ;;  %v1133_v42 = vld [vmem:[%s1812_s3 + $0x3] ss:$0 sm:$0xff] }
 0x2be   :  { %v729_v30 = vpack.c.bf16 %v727_v48, %v727_v48  ;;  %v967_v48 = vld [vmem:[%s1810_s1 + $0x48] sm:$0xff] }
 0x2c0   :  { %v754_v50 = vunpack.c.l.b16 %v729_v30  ;;  %v983_v30 = vld [vmem:[%s1810_s1 + $0xc8] sm:$0xff] }
 0x2c2   :  { %v756_v51 = vsel %vm755_vm1, %v754_v50, %v753_v49  ;;  %v1007_v49 = vadd.f32 %v1006_v46, %v1005_v43  ;;  %v1044_v50 = vadd.f32 %v1043_v47, %v1042_v45 }
 0x2c3   :  { %v757_v52 = vpack.c.b16 %v756_v51, %v756_v51  ;;  %v1008_v51 = vsel %vm990_vm2, %v967_v48, 0.0 }
 0x2c5   :  { %1321 = vmatmul.mubr.bf16.vlgmr.msra.gmra.mrb[32].mxu0 %v757_v52  ;;  %v1045_v52 = vsel %vm990_vm2, %v983_v30, 0.0 }
 0x398   :  { %v841_v54 = vpop.f32.mrb[32].mxu0 }
 0x399   :  { %v842_v55 = vadd.f32 %v1124_v53, %v841_v54  ;;  %v1322_v56 = vpop.f32.mrb[33].mxu0  ;;  %v968_v53 = vld [vmem:[%s1810_s1 + $0x50] sm:$0xff] }
 0x39a   :  { %v844_v57 = vpop.f32.mrb[34].mxu0  ;;  %v984_v54 = vld [vmem:[%s1810_s1 + $0xd0] sm:$0xff]  ;;  %v1046_v56 = vadd.f32 %v1045_v52, %v1044_v50 }
 0x39b   :  { %v847_v58 = vmax.f32 %v842_v55, 0.0  ;;  %v1323_v59 = vpop.f32.mrb[35].mxu0  ;;  %v1009_v55 = vadd.f32 %v1008_v51, %v1007_v49  ;;  %v1010_v57 = vsel %vm990_vm2, %v968_v53, 0.0 }
 0x39c   :  { %v969_v59 = vld [vmem:[%s1810_s1 + $0x58] sm:$0xff] }
 0x39d   :  { %v848_v60 = vpack.c.bf16 %v847_v58, %v847_v58  ;;  %v1047_v58 = vsel %vm990_vm2, %v984_v54, 0.0  ;;  %v1011_v61 = vadd.f32 %v1010_v57, %v1009_v55  ;;  %v1012_v63 = vsel %vm990_vm2, %v969_v59, 0.0 }
 0x39e   :  { %v1048_v62 = vadd.f32 %v1047_v58, %v1046_v56 }
 0x39f   :  { %1341 = vmatmul.mubr.bf16.vlgmr.msra.gmra.mrb[32].mxu1 %v848_v60  ;;  %v985_v60 = vld [vmem:[%s1810_s1 + $0xd8] sm:$0xff]  ;;  %v1013_v3 = vadd.f32 %v1012_v63, %v1011_v61 }
 0x3a0   :  { %v1049_v0 = vsel %vm990_vm2, %v985_v60, 0.0 }
 0x3a1   :  { %v1050_v4 = vadd.f32 %v1049_v0, %v1048_v62  ;;  %v1015_v9 = vadd.f32 %v1014_v5, %v1013_v3 }
 0x3a3   :  { %v1052_v10 = vadd.f32 %v1051_v6, %v1050_v4  ;;  %v1017_v15 = vadd.f32 %v1016_v11, %v1015_v9 }
 0x3a5   :  { %v1054_v16 = vadd.f32 %v1053_v12, %v1052_v10  ;;  %v1019_v32 = vadd.f32 %v1018_v17, %v1017_v15 }
 0x3a7   :  { %v1056_v21 = vadd.f32 %v1055_v18, %v1054_v16  ;;  %v1021_v24 = vadd.f32 %v1020_v22, %v1019_v32 }
 0x3a9   :  { %v1058_v25 = vadd.f32 %v1057_v23, %v1056_v21  ;;  %v1022_v26 = vrot.slane %v1021_v24, 4 }
 0x3ab   :  { %v1059_v27 = vrot.slane %v1058_v25, 4  ;;  %v1023_v28 = vadd.f32 %v1022_v26, %v1021_v24 }
 0x3ad   :  { %v1060_v29 = vadd.f32 %v1059_v27, %v1058_v25  ;;  %v1024_v31 = vrot.slane %v1023_v28, 2 }
 0x3af   :  { %v1061_v33 = vrot.slane %v1060_v29, 2  ;;  %v1025_v34 = vadd.f32 %v1024_v31, %v1023_v28 }
 0x3b1   :  { %v1062_v35 = vadd.f32 %v1061_v33, %v1060_v29  ;;  %v1026_v36 = vrot.slane %v1025_v34, 1 }
 0x3b3   :  { %v1063_v37 = vrot.slane %v1062_v35, 1  ;;  %v1027_v38 = vadd.f32 %v1026_v36, %v1025_v34 }
 0x3b5   :  { %v1064_v39 = vadd.f32 %v1063_v37, %v1062_v35  ;;  %v1066_v40 = vmul.f32 0.0078125, %v1027_v38 }
 0x3b7   :  { %v1067_v41 = vmul.f32 0.0078125, %v1064_v39 }
 0x3b9   :  { %v1070_v43 = vsel %vm755_vm1, %v1067_v41, %v1066_v40 }
 0x472   :  { %v952_v44 = vpop.f32.mrb[32].mxu1 }
 0x473   :  { %v953_v45 = vadd.f32 %v1133_v42, %v952_v44  ;;  %v1342_v46 = vpop.f32.mrb[33].mxu1 }
 0x474   :  { %v955_v47 = vpop.f32.mrb[34].mxu1 }
 0x475   :  { %v1072_v48 = vadd.f32 %v1070_v43, %v953_v45  ;;  %v1343_v30 = vpop.f32.mrb[35].mxu1 }
 0x477   :  { %1074 = vst.msk [vmem:[#allocation5] sm:$0x3] %vm1073_vm3, %v1072_v48 }
 0x478   :  { %1415 = shalt.err (!%p1412_p12)
}
 0x479   :  { %s1416_s30 = scalar_lea.hbm %s1813_s4, 32 }
 0x47a   :  { %p1417_p13 = scmp.ne.s32.totalorder %s1813_s4, %s1416_s30  ;;  %p1420_p0 = scmp.lt.u32.totalorder %s1416_s30, %s1813_s4 }
 0x47c   :  { %p1422_p1 = pnand %p1420_p0, %p1417_p13 }
 0x47e   :  { %1425 = shalt.err (!%p1422_p1)
}
 0x47f   :  { %1084 = dma.vmem_to_hbm [thread:$0]  %s1082_s27, 32, %s1813_s4, [#allocation4]  }
 0x480   :  { %1428 = dma.done.wait [#allocation4], 32  }
 0x481   :  { %1429 = vsyncadd [#allocation4], 4294967264 }
 0x482   :  { %1088 = vsyncpa [#allocation3], 1 }
 0x483   :  { %1089 = vsyncpa [#allocation4], 1 }

</bundles_post_ra>
